<compile_context>
chip_gen: v6e
topology: v6e:2x2x1
jax: 0.10.0
libtpu: 0.0.40
codegen_flags: <defaults>
</compile_context>

<pallas_src>
import functools

import jax
import jax.numpy as jnp
from jax.experimental import pallas as pl
from jax.experimental.pallas import tpu as pltpu

_LANE = 128
_SUBLANE = 16    # bf16 sublane packing (also a multiple of the f32 rule of 8)
_MAX_TB = 512    # upper bound on batch-tile rows


def _round_up(x, m):
    return (x + m - 1) // m * m


def _vmem_capacity_bytes():
    """Per-core VMEM capacity; conservative v7x default if the query fails."""
    try:
        return int(pltpu.get_tpu_info().vmem_capacity_bytes)
    except Exception:
        return 64 << 20


# --------------------------------------------------------------------------
# Kernel
# --------------------------------------------------------------------------
def _mlp_kernel(x_ref,
                w1_ref, b1_ref,
                w2_ref, b2_ref,
                w3_ref, b3_ref,
                w4_ref, b4_ref,
                w5_ref, b5_ref,
                w6_ref, b6_ref,
                o_ref):
    """One batch tile: six chained linears, ReLU after the first five.

    bf16 activations/weights on the MXU with f32 accumulation; biases added in
    f32.  Dropout is inference-mode identity.  Hidden/output dims are
    lane-padded (zeros), so every matmul is full-width and the final store is
    lane-dense.
    """
    def dense(h, w_ref, b_ref, relu):
        y = jnp.dot(h, w_ref[...], preferred_element_type=jnp.float32) + b_ref[...]
        return jnp.maximum(y, 0.0) if relu else y

    h = x_ref[...]                                        # (tb, F) bf16
    h = dense(h, w1_ref, b1_ref, True).astype(jnp.bfloat16)
    h = dense(h, w2_ref, b2_ref, True).astype(jnp.bfloat16)
    h = dense(h, w3_ref, b3_ref, True).astype(jnp.bfloat16)
    h = dense(h, w4_ref, b4_ref, True).astype(jnp.bfloat16)
    h = dense(h, w5_ref, b5_ref, True).astype(jnp.bfloat16)
    o_ref[...] = dense(h, w6_ref, b6_ref, False)          # (tb, OUT_PAD) f32


# --------------------------------------------------------------------------
# One-time parameter preparation (outside the per-call jitted path)
# --------------------------------------------------------------------------
def prepare_model(embedding, params):
    """Cast/pad parameters once.

    - embedding table and all weights -> bf16,
    - hidden and output dims zero-padded to multiples of 128 (lane-dense MXU
      passes and unmasked stores); biases stay f32,
    - padding is exact: padded weight columns give zero pre-activations,
      relu(0) = 0, and padded rows/cols contribute nothing downstream.
    """
    f = params["w1"].shape[0]
    hidden = params["w1"].shape[1]
    num_classes = params["w6"].shape[1]
    h_pad = _round_up(hidden, _LANE)      # 128 is enough for v5e; for large
    out_pad = _round_up(num_classes, _LANE)  # hidden it is a multiple anyway

    def pad2(a, rows, cols):
        return jnp.pad(a, ((0, rows - a.shape[0]), (0, cols - a.shape[1])))

    prep = {
        "emb": embedding.astype(jnp.bfloat16),
        "num_classes": int(num_classes),
    }
    dims = {1: (f, h_pad), 2: (h_pad, h_pad), 3: (h_pad, h_pad),
            4: (h_pad, h_pad), 5: (h_pad, h_pad), 6: (h_pad, out_pad)}
    for i, (rows, cols) in dims.items():
        prep[f"w{i}"] = pad2(params[f"w{i}"], rows, cols).astype(jnp.bfloat16)
        prep[f"b{i}"] = pad2(params[f"b{i}"], 1, cols).astype(jnp.float32)
    return prep


# --------------------------------------------------------------------------
# Pallas-wrapped MLP
# --------------------------------------------------------------------------
def _two_sentence_mlp(embed_flat, prep):
    """Batch-tiled Pallas MLP. embed_flat: (B, F) bf16 -> (B, num_classes) f32."""
    B, F = embed_flat.shape
    num_classes = prep["num_classes"]
    h_pad = prep["w2"].shape[0]
    out_pad = prep["w6"].shape[1]

    param_list = []
    for i in range(1, 7):
        param_list += [prep[f"w{i}"], prep[f"b{i}"]]
    weight_bytes = sum(int(a.size) * a.dtype.itemsize for a in param_list)

    # ---- VMEM- and megacore-aware batch tiling ----------------------------
    vmem_cap = _vmem_capacity_bytes()
    resident = 2 * weight_bytes          # constant blocks, default double-buffer
    headroom = 16 << 20                  # f32 temps / casts / compiler scratch
    per_row = 2 * F * 2 + 2 * out_pad * 4 + 4 * h_pad * 4
    tile_budget = int(vmem_cap * 0.75) - resident - headroom
    max_tb = min(_MAX_TB,
                 max(_SUBLANE,
                     (max(tile_budget, 0) // per_row) // _SUBLANE * _SUBLANE))
    # TODO(synk): if the resident weights alone overflow VMEM (very large
    #             F * hidden), split F over an extra grid axis with an f32
    #             accumulator (pl.when init/finalize, axis marked "arbitrary").

    rows16 = _round_up(B, _SUBLANE)
    n_tiles = pl.cdiv(rows16, max_tb)
    if n_tiles == 1 and rows16 >= 4 * _SUBLANE:
        n_tiles = 2                      # keep both v7x TensorCores busy
    if n_tiles == 1:
        tb = B                           # one block == full array rows, no masking
    else:
        tb = min(max_tb, _round_up(pl.cdiv(B, n_tiles), _SUBLANE))
    grid = (pl.cdiv(B, tb),)             # ragged last block; rows independent

    # ---- specs -------------------------------------------------------------
    x_spec = pl.BlockSpec((tb, F), lambda i: (i, 0))          # moves with grid
    const_specs = [pl.BlockSpec(a.shape, lambda i: (0, 0))    # VMEM resident
                   for a in param_list]
    out_spec = pl.BlockSpec((tb, out_pad), lambda i: (i, 0))  # lane-dense store

    tile_bytes = tb * F * 2 + tb * out_pad * 4
    vmem_limit = int(min(vmem_cap, 2 * tile_bytes + resident + headroom))

    flops = 2 * B * (F * h_pad + 4 * h_pad * h_pad + h_pad * out_pad)
    bytes_accessed = B * F * 2 + weight_bytes + B * out_pad * 4
    cost = pl.CostEstimate(flops=flops, transcendentals=0,
                           bytes_accessed=bytes_accessed)

    out = pl.pallas_call(
        _mlp_kernel,
        out_shape=jax.ShapeDtypeStruct((B, out_pad), jnp.float32),
        grid=grid,
        in_specs=[x_spec] + const_specs,
        out_specs=out_spec,
        compiler_params=pltpu.CompilerParams(
            dimension_semantics=("parallel",),   # v7x: shard batch tiles on 2 TCs
            vmem_limit_bytes=vmem_limit,
        ),
        cost_estimate=cost,
    )(embed_flat, *param_list)

    return out[:, :num_classes]


def two_sentence_model_forward(x, sent1_lengths, sent2_lengths, prep):
    """Full forward pass matching TwoSentenceModel.forward semantics."""
    del sent1_lengths, sent2_lengths      # unused by the reference forward
    x = x.astype(jnp.int32)
    sents = jnp.concatenate([x[:, 0, :], x[:, 1, :]], axis=1)   # (B, 2L)
    # TODO(synk): fuse this gather into the kernel (see header note).
    embed = jnp.take(prep["emb"], sents, axis=0)                # (B, 2L, E) bf16
    embed_flat = embed.reshape(embed.shape[0], -1)              # free reshape
    return _two_sentence_mlp(embed_flat, prep)


# --------------------------------------------------------------------------
# Init + reference (for the bf16-aware correctness check)
# --------------------------------------------------------------------------
def _uniform_init(key, shape, fan_in):
    bound = 1.0 / jnp.sqrt(jnp.float32(fan_in))
    return jax.random.uniform(key, shape, jnp.float32, -bound, bound)


def init_params(key, input_size, hidden_size, num_classes):
    """PyTorch nn.Linear-style init; weights stored (in, out) so kernel does x@W+b."""
    sizes = [(input_size, hidden_size)] + [(hidden_size, hidden_size)] * 4 + \
            [(hidden_size, num_classes)]
    params = {}
    for i, (fin, fout) in enumerate(sizes, start=1):
        key, kw, kb = jax.random.split(key, 3)
        params[f"w{i}"] = _uniform_init(kw, (fin, fout), fin)
        params[f"b{i}"] = _uniform_init(kb, (1, fout), fin)
    return params


def _reference_forward(x, prep, num_classes):
    """Pure-JAX f32 reference over the same (bf16-rounded, padded) parameters."""
    x = x.astype(jnp.int32)
    sents = jnp.concatenate([x[:, 0, :], x[:, 1, :]], axis=1)
    embed = jnp.take(prep["emb"].astype(jnp.float32), sents, axis=0)
    h = embed.reshape(embed.shape[0], -1)
    for i in range(1, 6):
        h = jnp.maximum(h @ prep[f"w{i}"].astype(jnp.float32) + prep[f"b{i}"], 0.0)
    logits = h @ prep["w6"].astype(jnp.float32) + prep["b6"]
    return logits[:, :num_classes]


if __name__ == "__main__":
    # Small, module-consistent shapes.
    batch = 2
    max_sent_length = 8          # MAX_SENTENCE_LENGTH
    emb_size = 16                # embedding width (word_vectors dim)
    vocab_size = 50
    hidden_size = 32
    num_classes = 4
    input_size = 2 * emb_size * max_sent_length   # 256

    key = jax.random.PRNGKey(0)
    k_emb, k_tok, k_par = jax.random.split(key, 3)

    embedding = jax.random.normal(k_emb, (vocab_size, emb_size), jnp.float32)
    x = jax.random.randint(k_tok, (batch, 2, max_sent_length), 0, vocab_size,
                           jnp.int32)
    sent1_lengths = jnp.full((batch,), max_sent_length, jnp.int32)
    sent2_lengths = jnp.full((batch,), max_sent_length, jnp.int32)

    params = init_params(k_par, input_size, hidden_size, num_classes)
    prep = prepare_model(embedding, params)    # one-time cast/pad, outside jit

    fwd = jax.jit(functools.partial(two_sentence_model_forward, prep=prep))
    logits = fwd(x, sent1_lengths, sent2_lengths)
    jax.block_until_ready(logits)

    assert logits.shape == (batch, num_classes)
    assert logits.dtype == jnp.float32

    # bf16-aware tolerance (kernel casts activations to bf16 between layers).
    ref = _reference_forward(x, prep, num_classes)
    assert jnp.allclose(logits, ref, rtol=5e-2, atol=5e-2)

    print("KERNEL_OK")
</pallas_src>

<mosaic_0001>
module attributes {stable_mosaic.version = 11 : i64} {
  func.func @_mlp_kernel(%arg0: i32, %arg1: memref<2x256xbf16, #tpu.memory_space<vmem>>, %arg2: memref<256x128xbf16, #tpu.memory_space<vmem>>, %arg3: memref<1x128xf32, #tpu.memory_space<vmem>>, %arg4: memref<128x128xbf16, #tpu.memory_space<vmem>>, %arg5: memref<1x128xf32, #tpu.memory_space<vmem>>, %arg6: memref<128x128xbf16, #tpu.memory_space<vmem>>, %arg7: memref<1x128xf32, #tpu.memory_space<vmem>>, %arg8: memref<128x128xbf16, #tpu.memory_space<vmem>>, %arg9: memref<1x128xf32, #tpu.memory_space<vmem>>, %arg10: memref<128x128xbf16, #tpu.memory_space<vmem>>, %arg11: memref<1x128xf32, #tpu.memory_space<vmem>>, %arg12: memref<128x128xbf16, #tpu.memory_space<vmem>>, %arg13: memref<1x128xf32, #tpu.memory_space<vmem>>, %arg14: memref<2x128xf32, #tpu.memory_space<vmem>>) attributes {dimension_semantics = [#tpu.dimension_semantics<parallel>], iteration_bounds = array<i64: 1>, scalar_prefetch = 0 : i64, scratch_operands = 0 : i64, tpu.core_type = #tpu.core_type<tc>, window_params = [{transform_indices = @transform_0, window_bounds = array<i64: 2, 256>}, {pipeline_mode = #tpu.pipeline_mode<synchronous>, transform_indices = @transform_1, window_bounds = array<i64: 256, 128>}, {pipeline_mode = #tpu.pipeline_mode<synchronous>, transform_indices = @transform_2, window_bounds = array<i64: 1, 128>}, {pipeline_mode = #tpu.pipeline_mode<synchronous>, transform_indices = @transform_3, window_bounds = array<i64: 128, 128>}, {pipeline_mode = #tpu.pipeline_mode<synchronous>, transform_indices = @transform_4, window_bounds = array<i64: 1, 128>}, {pipeline_mode = #tpu.pipeline_mode<synchronous>, transform_indices = @transform_5, window_bounds = array<i64: 128, 128>}, {pipeline_mode = #tpu.pipeline_mode<synchronous>, transform_indices = @transform_6, window_bounds = array<i64: 1, 128>}, {pipeline_mode = #tpu.pipeline_mode<synchronous>, transform_indices = @transform_7, window_bounds = array<i64: 128, 128>}, {pipeline_mode = #tpu.pipeline_mode<synchronous>, transform_indices = @transform_8, window_bounds = array<i64: 1, 128>}, {pipeline_mode = #tpu.pipeline_mode<synchronous>, transform_indices = @transform_9, window_bounds = array<i64: 128, 128>}, {pipeline_mode = #tpu.pipeline_mode<synchronous>, transform_indices = @transform_10, window_bounds = array<i64: 1, 128>}, {pipeline_mode = #tpu.pipeline_mode<synchronous>, transform_indices = @transform_11, window_bounds = array<i64: 128, 128>}, {pipeline_mode = #tpu.pipeline_mode<synchronous>, transform_indices = @transform_12, window_bounds = array<i64: 1, 128>}, {transform_indices = @transform_13, window_bounds = array<i64: 2, 128>}]} {
    %c0 = arith.constant 0 : index
    %c0_0 = arith.constant 0 : index
    %0 = vector.load %arg1[%c0, %c0_0] : memref<2x256xbf16, #tpu.memory_space<vmem>>, vector<2x256xbf16>
    %c0_1 = arith.constant 0 : index
    %c0_2 = arith.constant 0 : index
    %1 = vector.load %arg2[%c0_1, %c0_2] : memref<256x128xbf16, #tpu.memory_space<vmem>>, vector<256x128xbf16>
    %cst = arith.constant dense<0.000000e+00> : vector<2x128xf32>
    %2 = tpu.matmul %0, %1, %cst {dimension_numbers = #tpu.dot_dimension_numbers<[1], [0], [0], [1], [0, 0, 1, 1], [], []>} : vector<2x256xbf16>, vector<256x128xbf16>, vector<2x128xf32> -> vector<2x128xf32>
    %c0_3 = arith.constant 0 : index
    %c0_4 = arith.constant 0 : index
    %3 = vector.load %arg3[%c0_3, %c0_4] : memref<1x128xf32, #tpu.memory_space<vmem>>, vector<1x128xf32>
    %4 = vector.broadcast %3 : vector<1x128xf32> to vector<2x128xf32>
    %5 = arith.addf %2, %4 : vector<2x128xf32>
    %cst_5 = arith.constant 0.000000e+00 : f32
    %6 = vector.broadcast %cst_5 : f32 to vector<2x128xf32>
    %7 = arith.maximumf %5, %6 : vector<2x128xf32>
    %8 = arith.truncf %7 : vector<2x128xf32> to vector<2x128xbf16>
    %c0_6 = arith.constant 0 : index
    %c0_7 = arith.constant 0 : index
    %9 = vector.load %arg4[%c0_6, %c0_7] : memref<128x128xbf16, #tpu.memory_space<vmem>>, vector<128x128xbf16>
    %cst_8 = arith.constant dense<0.000000e+00> : vector<2x128xf32>
    %10 = tpu.matmul %8, %9, %cst_8 {dimension_numbers = #tpu.dot_dimension_numbers<[1], [0], [0], [1], [0, 0, 1, 1], [], []>} : vector<2x128xbf16>, vector<128x128xbf16>, vector<2x128xf32> -> vector<2x128xf32>
    %c0_9 = arith.constant 0 : index
    %c0_10 = arith.constant 0 : index
    %11 = vector.load %arg5[%c0_9, %c0_10] : memref<1x128xf32, #tpu.memory_space<vmem>>, vector<1x128xf32>
    %12 = vector.broadcast %11 : vector<1x128xf32> to vector<2x128xf32>
    %13 = arith.addf %10, %12 : vector<2x128xf32>
    %cst_11 = arith.constant 0.000000e+00 : f32
    %14 = vector.broadcast %cst_11 : f32 to vector<2x128xf32>
    %15 = arith.maximumf %13, %14 : vector<2x128xf32>
    %16 = arith.truncf %15 : vector<2x128xf32> to vector<2x128xbf16>
    %c0_12 = arith.constant 0 : index
    %c0_13 = arith.constant 0 : index
    %17 = vector.load %arg6[%c0_12, %c0_13] : memref<128x128xbf16, #tpu.memory_space<vmem>>, vector<128x128xbf16>
    %cst_14 = arith.constant dense<0.000000e+00> : vector<2x128xf32>
    %18 = tpu.matmul %16, %17, %cst_14 {dimension_numbers = #tpu.dot_dimension_numbers<[1], [0], [0], [1], [0, 0, 1, 1], [], []>} : vector<2x128xbf16>, vector<128x128xbf16>, vector<2x128xf32> -> vector<2x128xf32>
    %c0_15 = arith.constant 0 : index
    %c0_16 = arith.constant 0 : index
    %19 = vector.load %arg7[%c0_15, %c0_16] : memref<1x128xf32, #tpu.memory_space<vmem>>, vector<1x128xf32>
    %20 = vector.broadcast %19 : vector<1x128xf32> to vector<2x128xf32>
    %21 = arith.addf %18, %20 : vector<2x128xf32>
    %cst_17 = arith.constant 0.000000e+00 : f32
    %22 = vector.broadcast %cst_17 : f32 to vector<2x128xf32>
    %23 = arith.maximumf %21, %22 : vector<2x128xf32>
    %24 = arith.truncf %23 : vector<2x128xf32> to vector<2x128xbf16>
    %c0_18 = arith.constant 0 : index
    %c0_19 = arith.constant 0 : index
    %25 = vector.load %arg8[%c0_18, %c0_19] : memref<128x128xbf16, #tpu.memory_space<vmem>>, vector<128x128xbf16>
    %cst_20 = arith.constant dense<0.000000e+00> : vector<2x128xf32>
    %26 = tpu.matmul %24, %25, %cst_20 {dimension_numbers = #tpu.dot_dimension_numbers<[1], [0], [0], [1], [0, 0, 1, 1], [], []>} : vector<2x128xbf16>, vector<128x128xbf16>, vector<2x128xf32> -> vector<2x128xf32>
    %c0_21 = arith.constant 0 : index
    %c0_22 = arith.constant 0 : index
    %27 = vector.load %arg9[%c0_21, %c0_22] : memref<1x128xf32, #tpu.memory_space<vmem>>, vector<1x128xf32>
    %28 = vector.broadcast %27 : vector<1x128xf32> to vector<2x128xf32>
    %29 = arith.addf %26, %28 : vector<2x128xf32>
    %cst_23 = arith.constant 0.000000e+00 : f32
    %30 = vector.broadcast %cst_23 : f32 to vector<2x128xf32>
    %31 = arith.maximumf %29, %30 : vector<2x128xf32>
    %32 = arith.truncf %31 : vector<2x128xf32> to vector<2x128xbf16>
    %c0_24 = arith.constant 0 : index
    %c0_25 = arith.constant 0 : index
    %33 = vector.load %arg10[%c0_24, %c0_25] : memref<128x128xbf16, #tpu.memory_space<vmem>>, vector<128x128xbf16>
    %cst_26 = arith.constant dense<0.000000e+00> : vector<2x128xf32>
    %34 = tpu.matmul %32, %33, %cst_26 {dimension_numbers = #tpu.dot_dimension_numbers<[1], [0], [0], [1], [0, 0, 1, 1], [], []>} : vector<2x128xbf16>, vector<128x128xbf16>, vector<2x128xf32> -> vector<2x128xf32>
    %c0_27 = arith.constant 0 : index
    %c0_28 = arith.constant 0 : index
    %35 = vector.load %arg11[%c0_27, %c0_28] : memref<1x128xf32, #tpu.memory_space<vmem>>, vector<1x128xf32>
    %36 = vector.broadcast %35 : vector<1x128xf32> to vector<2x128xf32>
    %37 = arith.addf %34, %36 : vector<2x128xf32>
    %cst_29 = arith.constant 0.000000e+00 : f32
    %38 = vector.broadcast %cst_29 : f32 to vector<2x128xf32>
    %39 = arith.maximumf %37, %38 : vector<2x128xf32>
    %40 = arith.truncf %39 : vector<2x128xf32> to vector<2x128xbf16>
    %c0_30 = arith.constant 0 : index
    %c0_31 = arith.constant 0 : index
    %41 = vector.load %arg12[%c0_30, %c0_31] : memref<128x128xbf16, #tpu.memory_space<vmem>>, vector<128x128xbf16>
    %cst_32 = arith.constant dense<0.000000e+00> : vector<2x128xf32>
    %42 = tpu.matmul %40, %41, %cst_32 {dimension_numbers = #tpu.dot_dimension_numbers<[1], [0], [0], [1], [0, 0, 1, 1], [], []>} : vector<2x128xbf16>, vector<128x128xbf16>, vector<2x128xf32> -> vector<2x128xf32>
    %c0_33 = arith.constant 0 : index
    %c0_34 = arith.constant 0 : index
    %43 = vector.load %arg13[%c0_33, %c0_34] : memref<1x128xf32, #tpu.memory_space<vmem>>, vector<1x128xf32>
    %44 = vector.broadcast %43 : vector<1x128xf32> to vector<2x128xf32>
    %45 = arith.addf %42, %44 : vector<2x128xf32>
    %c0_35 = arith.constant 0 : index
    %c0_36 = arith.constant 0 : index
    %46 = vector.load %arg14[%c0_35, %c0_36] : memref<2x128xf32, #tpu.memory_space<vmem>>, vector<2x128xf32>
    tpu.vector_store %arg14[%c0_35, %c0_36], %45 {strides = array<i32>} : memref<2x128xf32, #tpu.memory_space<vmem>>, vector<2x128xf32>,
    return
  }
  func.func @transform_0(%arg0: i32) -> (i32, i32) {
    %c0_i32 = arith.constant 0 : i32
    %c0_i32_0 = arith.constant 0 : i32
    return %arg0, %c0_i32 : i32, i32
  }
  func.func @transform_1(%arg0: i32) -> (i32, i32) {
    %c0_i32 = arith.constant 0 : i32
    %c0_i32_0 = arith.constant 0 : i32
    %c0_i32_1 = arith.constant 0 : i32
    return %c0_i32, %c0_i32_0 : i32, i32
  }
  func.func @transform_2(%arg0: i32) -> (i32, i32) {
    %c0_i32 = arith.constant 0 : i32
    %c0_i32_0 = arith.constant 0 : i32
    %c0_i32_1 = arith.constant 0 : i32
    return %c0_i32, %c0_i32_0 : i32, i32
  }
  func.func @transform_3(%arg0: i32) -> (i32, i32) {
    %c0_i32 = arith.constant 0 : i32
    %c0_i32_0 = arith.constant 0 : i32
    %c0_i32_1 = arith.constant 0 : i32
    return %c0_i32, %c0_i32_0 : i32, i32
  }
  func.func @transform_4(%arg0: i32) -> (i32, i32) {
    %c0_i32 = arith.constant 0 : i32
    %c0_i32_0 = arith.constant 0 : i32
    %c0_i32_1 = arith.constant 0 : i32
    return %c0_i32, %c0_i32_0 : i32, i32
  }
  func.func @transform_5(%arg0: i32) -> (i32, i32) {
    %c0_i32 = arith.constant 0 : i32
    %c0_i32_0 = arith.constant 0 : i32
    %c0_i32_1 = arith.constant 0 : i32
    return %c0_i32, %c0_i32_0 : i32, i32
  }
  func.func @transform_6(%arg0: i32) -> (i32, i32) {
    %c0_i32 = arith.constant 0 : i32
    %c0_i32_0 = arith.constant 0 : i32
    %c0_i32_1 = arith.constant 0 : i32
    return %c0_i32, %c0_i32_0 : i32, i32
  }
  func.func @transform_7(%arg0: i32) -> (i32, i32) {
    %c0_i32 = arith.constant 0 : i32
    %c0_i32_0 = arith.constant 0 : i32
    %c0_i32_1 = arith.constant 0 : i32
    return %c0_i32, %c0_i32_0 : i32, i32
  }
  func.func @transform_8(%arg0: i32) -> (i32, i32) {
    %c0_i32 = arith.constant 0 : i32
    %c0_i32_0 = arith.constant 0 : i32
    %c0_i32_1 = arith.constant 0 : i32
    return %c0_i32, %c0_i32_0 : i32, i32
  }
  func.func @transform_9(%arg0: i32) -> (i32, i32) {
    %c0_i32 = arith.constant 0 : i32
    %c0_i32_0 = arith.constant 0 : i32
    %c0_i32_1 = arith.constant 0 : i32
    return %c0_i32, %c0_i32_0 : i32, i32
  }
  func.func @transform_10(%arg0: i32) -> (i32, i32) {
    %c0_i32 = arith.constant 0 : i32
    %c0_i32_0 = arith.constant 0 : i32
    %c0_i32_1 = arith.constant 0 : i32
    return %c0_i32, %c0_i32_0 : i32, i32
  }
  func.func @transform_11(%arg0: i32) -> (i32, i32) {
    %c0_i32 = arith.constant 0 : i32
    %c0_i32_0 = arith.constant 0 : i32
    %c0_i32_1 = arith.constant 0 : i32
    return %c0_i32, %c0_i32_0 : i32, i32
  }
  func.func @transform_12(%arg0: i32) -> (i32, i32) {
    %c0_i32 = arith.constant 0 : i32
    %c0_i32_0 = arith.constant 0 : i32
    %c0_i32_1 = arith.constant 0 : i32
    return %c0_i32, %c0_i32_0 : i32, i32
  }
  func.func @transform_13(%arg0: i32) -> (i32, i32) {
    %c0_i32 = arith.constant 0 : i32
    %c0_i32_0 = arith.constant 0 : i32
    return %arg0, %c0_i32 : i32, i32
  }
}

</mosaic_0001>

<bundles_post_ra>
// kernel: two_sentence_model_forward.1
= control target key start
LH: loop header
LB: loop body
LE: loop exit
PB: predicated region body
PF: predicated region fallthrough
CT: control target
= control target key end

     0   :  { %18 = vsyncpa [#allocation3], 0  ;;  %s1539_s0 = inlined_call_operand.vmem [shape: bf16[2,256], index: 0, kind: input, shape index: {}]   ;;  %s1540_s1 = inlined_call_operand.vmem [shape: bf16[256,128], index: 1, kind: input, shape index: {}]   ;;  %s1541_s2 = inlined_call_operand.vmem [shape: f32[1,128], index: 2, kind: input, shape index: {}]   ;;  %s1542_s3 = inlined_call_operand.hbm [shape: bf16[128,128], index: 3, kind: input, shape index: {}]   ;;  %s1543_s4 = inlined_call_operand.vmem [shape: f32[1,128], index: 4, kind: input, shape index: {}]   ;;  %s1544_s5 = inlined_call_operand.hbm [shape: bf16[128,128], index: 5, kind: input, shape index: {}]   ;;  %s1545_s6 = inlined_call_operand.vmem [shape: f32[1,128], index: 6, kind: input, shape index: {}]   ;;  %s1546_s7 = inlined_call_operand.hbm [shape: bf16[128,128], index: 7, kind: input, shape index: {}]   ;;  %s1547_s8 = inlined_call_operand.vmem [shape: f32[1,128], index: 8, kind: input, shape index: {}]   ;;  %s1548_s9 = inlined_call_operand.hbm [shape: bf16[128,128], index: 9, kind: input, shape index: {}]   ;;  %s1549_s10 = inlined_call_operand.vmem [shape: f32[1,128], index: 10, kind: input, shape index: {}]   ;;  %s1550_s11 = inlined_call_operand.vmem [shape: bf16[128,128], index: 11, kind: input, shape index: {}]   ;;  %s1551_s12 = inlined_call_operand.vmem [shape: f32[1,128], index: 12, kind: input, shape index: {}]   ;;  %s1552_s13 = inlined_call_operand.hbm [shape: f32[2,128], index: 13, kind: output, shape index: {}]  }
   0x1   :  { %19 = vsyncpa [#allocation6], 0 }
   0x2   :  { %20 = vsyncpa [#allocation9], 0 }
   0x3   :  { %21 = vsyncpa [#allocation4], 0  ;;  %s1289_s25 = smov [#allocation5]   ;;  %s1290_s27 = smov [#allocation2]  }
   0x4   :  { %s47_s26 = sshll.u32 %s1289_s25, 4  ;;  %s33_s28 = sshll.u32 %s1290_s27, 4  ;;  %s48_s26 = int_to_ptr.vmem [resolvable:$true] %s47_s26  ;;  %s34_s28 = int_to_ptr.vmem [resolvable:$true] %s33_s28 }
   0x5   :  { %s1189_s29 = scalar_lea.vmem %s48_s26, 1024  ;;  %p1194_p1 = scmp.lt.s32.totalorder %s48_s26, %s48_s26 }
   0x6   :  { %p1190_p0 = scmp.ne.s32.totalorder %s48_s26, %s1189_s29  ;;  %p1195_p2 = scmp.lt.s32.totalorder %s1189_s29, %s1189_s29 }
   0x8   :  { %p1196_p3 = por %p1195_p2, %p1194_p1 }
   0xa   :  { %p1197_p4 = pnand %p1196_p3, %p1190_p0 }
   0xc   :  { %1200 = shalt.err (!%p1197_p4)
}
   0xd   :  { %s1291_s30 = smov 64   ;;  %s1292_s14 = smov 4  }
   0xe   :  { %53 = dma.hbm_to_vmem [thread:$0]  %s1544_s5, 1024, %s48_s26, [#allocation6], %s1291_s30, %s1291_s30, %s1292_s14  }
   0xf   :  { %s1209_s17 = scalar_lea.vmem %s34_s28, 1024  ;;  %p1214_p6 = scmp.lt.s32.totalorder %s34_s28, %s34_s28 }
  0x10   :  { %p1210_p5 = scmp.ne.s32.totalorder %s34_s28, %s1209_s17  ;;  %p1215_p7 = scmp.lt.s32.totalorder %s1209_s17, %s1209_s17 }
  0x12   :  { %p1216_p8 = por %p1215_p7, %p1214_p6 }
  0x14   :  { %p1217_p9 = pnand %p1216_p8, %p1210_p5 }
  0x16   :  { %1220 = shalt.err (!%p1217_p9)
}
  0x17   :  { %39 = dma.hbm_to_vmem [thread:$0]  %s1542_s3, 1024, %s34_s28, [#allocation3], %s1291_s30, %s1291_s30, %s1292_s14  }
  0x18   :  { %s1293_s20 = smov [#allocation7]   ;;  %s1294_s22 = smov [#allocation8]  }
  0x19   :  { %s61_s21 = sshll.u32 %s1293_s20, 4  ;;  %s75_s23 = sshll.u32 %s1294_s22, 4  ;;  %s62_s21 = int_to_ptr.vmem [resolvable:$true] %s61_s21  ;;  %s76_s23 = int_to_ptr.vmem [resolvable:$true] %s75_s23 }
  0x1a   :  { %s1229_s5 = scalar_lea.vmem %s62_s21, 1024  ;;  %p1234_p11 = scmp.lt.s32.totalorder %s62_s21, %s62_s21 }
  0x1b   :  { %p1230_p10 = scmp.ne.s32.totalorder %s62_s21, %s1229_s5  ;;  %p1235_p12 = scmp.lt.s32.totalorder %s1229_s5, %s1229_s5 }
  0x1d   :  { %p1236_p13 = por %p1235_p12, %p1234_p11 }
  0x1f   :  { %p1237_p0 = pnand %p1236_p13, %p1230_p10 }
  0x21   :  { %1240 = shalt.err (!%p1237_p0)
}
  0x22   :  { %67 = dma.hbm_to_vmem [thread:$0]  %s1546_s7, 1024, %s62_s21, [#allocation6], %s1291_s30, %s1291_s30, %s1292_s14  }
  0x23   :  { %s1249_s3 = scalar_lea.vmem %s76_s23, 1024  ;;  %p1254_p2 = scmp.lt.s32.totalorder %s76_s23, %s76_s23 }
  0x24   :  { %p1250_p1 = scmp.ne.s32.totalorder %s76_s23, %s1249_s3  ;;  %p1255_p3 = scmp.lt.s32.totalorder %s1249_s3, %s1249_s3 }
  0x26   :  { %p1256_p4 = por %p1255_p3, %p1254_p2 }
  0x28   :  { %p1257_p5 = pnand %p1256_p4, %p1250_p1 }
  0x2a   :  { %1260 = shalt.err (!%p1257_p5)
}
  0x2b   :  { %81 = dma.hbm_to_vmem [thread:$0]  %s1548_s9, 1024, %s76_s23, [#allocation9], %s1291_s30, %s1291_s30, %s1292_s14  }
  0x2c   :  { %1281 = dma.done.wait [#allocation3], 1024  }
  0x2d   :  { %1282 = vsyncadd [#allocation3], 4294966272 }
  0x2e   :  { %1283 = dma.done.wait [#allocation6], 2048  }
  0x2f   :  { %1284 = vsyncadd [#allocation6], 4294965248 }
  0x30   :  { %1285 = dma.done.wait [#allocation9], 1024  }
  0x31   :  { %1286 = vsyncadd [#allocation9], 4294966272  ;;  %v1295_v0 = vmov 0.0   ;;  %v1125_v1 = vld [vmem:[%s1540_s1 + $0x78] sm:$0xff]   ;;  %v1127_v3 = vld [vmem:[%s1540_s1 + $0x70] sm:$0xff]   ;;  %v153_v9 = vlaneseq  ;;  %vm1297_vm0 = vmmov 0  }
  0x32   :  { %1015 = vmatprep.subr.bf16.mxu1 %v1295_v0  ;;  %v1126_v2 = vld [vmem:[%s1540_s1 + $0x38] sm:$0xff]   ;;  %948 = vmatprep.subr.bf16.mxu0 %v1125_v1  ;;  %v1128_v4 = vld [vmem:[%s1540_s1 + $0x30] sm:$0xff]   ;;  %v1129_v5 = vld [vmem:[%s1540_s1 + $0x68] sm:$0xff]   ;;  %v1296_v7 = vmov 1966171168   ;;  %s1298_s21 = smov [#allocation10]  }
  0x33   :  { %949 = vmatpush3.bf16.msra.mxu0 %v1126_v2  ;;  %v1130_v6 = vld [vmem:[%s1540_s1 + $0x28] sm:$0xff]   ;;  %v151_v8 = vunpack.c.l.s4 %v1296_v7  ;;  %v1131_v10 = vld [vmem:[%s1540_s1 + $0x60] sm:$0xff]   ;;  %v154_v13 = vshrl.u32 %v153_v9, 7  ;;  %v1133_v14 = vld [vmem:[%s1540_s1 + $0x58] sm:$0xff]   ;;  %1031 = vmatprep.mubr.msk.bf16.mxu1 %vm1297_vm0, %v1295_v0 }
  0x34   :  { %950 = vmatprep.subr.bf16.mxu0 %v1127_v3  ;;  %v1132_v11 = vld [vmem:[%s1540_s1 + $0x20] sm:$0xff]   ;;  %v1134_v15 = vld [vmem:[%s1540_s1 + $0x18] sm:$0xff]   ;;  %v1135_v16 = vld [vmem:[%s1540_s1 + $0x50] sm:$0xff]  }
  0x35   :  { %v152_v12 = vunpack.c.0.s8 %v151_v8  ;;  %v886_v18 = vld.sshfl [vmem:[%s1539_s0] sm:$0x11 pattern:$0x75316420]  ;;  %v1141_v20 = vld [vmem:[#allocation2 + $0x38] sm:$0xff]   ;;  %v1136_v21 = vld [vmem:[%s1540_s1 + $0x10] sm:$0xff]  }
  0x36   :  { %v149_v19 = vcombine.high %v886_v18, %v886_v18  ;;  %1016 = vmatpush3.bf16.msra.mxu1 %v1141_v20  ;;  %v1142_v23 = vld [vmem:[#allocation2 + $0x30] sm:$0xff]   ;;  %v1137_v24 = vld [vmem:[%s1540_s1 + $0x48] sm:$0xff]   ;;  %v1139_v27 = vld [vmem:[%s1540_s1 + $0x40] sm:$0xff]  }
  0x37   :  { %951 = vmatpush3.bf16.msra.mxu0 %v1128_v4  ;;  %v155_v17 = vsub.s32 %v152_v12, %v154_v13  ;;  %1017 = vmatprep.subr.bf16.mxu1 %v1295_v0  ;;  %v1138_v25 = vld [vmem:[%s1540_s1 + $0x8] sm:$0xff]   ;;  %v1140_v28 = vld [vmem:[%s1540_s1] sm:$0xff]   ;;  %v1145_v30 = vld [vmem:[#allocation2 + $0x18] sm:$0xff]  }
  0x38   :  { %952 = vmatprep.subr.bf16.mxu0 %v1129_v5  ;;  %v1143_v26 = vld [vmem:[#allocation2 + $0x28] sm:$0xff]   ;;  %v1144_v29 = vld [vmem:[#allocation2 + $0x20] sm:$0xff]   ;;  %v1146_v32 = vld [vmem:[#allocation2 + $0x10] sm:$0xff]  }
  0x39   :  { %v163_v22 = vrot.slane %v149_v19, %v155_v17  ;;  %v156_v31 = vrot.slane %v886_v18, %v155_v17  ;;  %v1147_v33 = vld [vmem:[#allocation2 + $0x8] sm:$0xff]   ;;  %v1148_v34 = vld [vmem:[#allocation2] sm:$0xff]   ;;  %v1149_v35 = vld [vmem:[#allocation5 + $0x38] sm:$0xff]  }
  0x3a   :  { %1018 = vmatpush3.bf16.msra.mxu1 %v1142_v23  ;;  %v1150_v36 = vld [vmem:[#allocation5 + $0x30] sm:$0xff]   ;;  %v1151_v37 = vld [vmem:[#allocation5 + $0x28] sm:$0xff]   ;;  %v1152_v38 = vld [vmem:[#allocation5 + $0x20] sm:$0xff]  }
  0x3b   :  { %953 = vmatpush3.bf16.msra.mxu0 %v1130_v6  ;;  %294 = vmatprep.mubr.bf16.mxu0 %v163_v22  ;;  %v1153_v39 = vld [vmem:[#allocation5 + $0x18] sm:$0xff]   ;;  %v1154_v40 = vld [vmem:[#allocation5 + $0x10] sm:$0xff]   ;;  %v885_v42 = vld [vmem:[%s1541_s2] ss:$0 sm:$0xff]  ;;  %s874_s2 = sshll.u32 %s1298_s21, 4  ;;  %s875_s2 = int_to_ptr.vmem [resolvable:$true] %s874_s2 }
  0x3c   :  { %954 = vmatprep.subr.bf16.mxu0 %v1131_v10  ;;  %1019 = vmatprep.subr.bf16.mxu1 %v1295_v0  ;;  %v1155_v50 = vld [vmem:[#allocation5 + $0x8] sm:$0xff]   ;;  %v1156_v51 = vld [vmem:[#allocation5] sm:$0xff]   ;;  %v1157_v52 = vld [vmem:[#allocation7 + $0x38] sm:$0xff]   ;;  %p1266_p7 = scmp.lt.s32.totalorder %s875_s2, %s875_s2 }
  0x3d   :  { %v1158_v53 = vld [vmem:[#allocation7 + $0x30] sm:$0xff]   ;;  %v1159_v54 = vld [vmem:[#allocation7 + $0x28] sm:$0xff]   ;;  %v1160_v55 = vld [vmem:[#allocation7 + $0x20] sm:$0xff]  }
  0x3e   :  { %1020 = vmatpush3.bf16.msra.mxu1 %v1143_v26  ;;  %v1161_v56 = vld [vmem:[#allocation7 + $0x18] sm:$0xff]   ;;  %v1162_v57 = vld [vmem:[#allocation7 + $0x10] sm:$0xff]   ;;  %v903_v58 = vld [vmem:[%s1543_s4] ss:$0 sm:$0xff] }
  0x3f   :  { %955 = vmatpush3.bf16.msra.mxu0 %v1132_v11  ;;  %1021 = vmatprep.subr.bf16.mxu1 %v1295_v0  ;;  %v1163_v3 = vld [vmem:[#allocation7 + $0x8] sm:$0xff]   ;;  %v1164_v4 = vld [vmem:[#allocation7] sm:$0xff]   ;;  %v1165_v5 = vld [vmem:[#allocation8 + $0x38] sm:$0xff]  }
  0x40   :  { %956 = vmatprep.subr.bf16.mxu0 %v1133_v14  ;;  %v1166_v6 = vld [vmem:[#allocation8 + $0x30] sm:$0xff]   ;;  %v1167_v7 = vld [vmem:[#allocation8 + $0x28] sm:$0xff]   ;;  %v1168_v8 = vld [vmem:[#allocation8 + $0x20] sm:$0xff]  }
  0x41   :  { %v1169_v9 = vld [vmem:[#allocation8 + $0x18] sm:$0xff]   ;;  %v1170_v10 = vld [vmem:[#allocation8 + $0x10] sm:$0xff]   ;;  %v912_v11 = vld [vmem:[%s1545_s6] ss:$0 sm:$0xff] }
  0x42   :  { %1022 = vmatpush3.bf16.msra.mxu1 %v1144_v29  ;;  %v1171_v19 = vld [vmem:[#allocation8 + $0x8] sm:$0xff]   ;;  %v1172_v20 = vld [vmem:[#allocation8] sm:$0xff]   ;;  %v1174_v22 = vld [vmem:[%s1550_s11 + $0x30] sm:$0xff]  }
  0x43   :  { %957 = vmatpush3.bf16.msra.mxu0 %v1134_v15  ;;  %1023 = vmatprep.subr.bf16.mxu1 %v1295_v0  ;;  %v1175_v23 = vld [vmem:[%s1550_s11 + $0x28] sm:$0xff]   ;;  %v1178_v26 = vld [vmem:[%s1550_s11 + $0x10] sm:$0xff]  }
  0x44   :  { %958 = vmatprep.subr.bf16.mxu0 %v1135_v16 }
  0x46   :  { %1024 = vmatpush3.bf16.msra.mxu1 %v1145_v30 }
  0x47   :  { %959 = vmatpush3.bf16.msra.mxu0 %v1136_v21  ;;  %1025 = vmatprep.subr.bf16.mxu1 %v1295_v0  ;;  %v1173_v21 = vld [vmem:[%s1550_s11 + $0x38] sm:$0xff]  }
  0x48   :  { %960 = vmatprep.subr.bf16.mxu0 %v1137_v24  ;;  %v1176_v24 = vld [vmem:[%s1550_s11 + $0x20] sm:$0xff]  }
  0x4a   :  { %1026 = vmatpush3.bf16.msra.mxu1 %v1146_v32 }
  0x4b   :  { %961 = vmatpush3.bf16.msra.mxu0 %v1138_v25  ;;  %1027 = vmatprep.subr.bf16.mxu1 %v1295_v0  ;;  %v1177_v25 = vld [vmem:[%s1550_s11 + $0x18] sm:$0xff]  }
  0x4c   :  { %962 = vmatprep.subr.bf16.mxu0 %v1139_v27  ;;  %v921_v27 = vld [vmem:[%s1547_s8] ss:$0 sm:$0xff] }
  0x4e   :  { %1028 = vmatpush3.bf16.msra.mxu1 %v1147_v33 }
  0x4f   :  { %963 = vmatpush3.bf16.msra.mxu0 %v1140_v28  ;;  %1029 = vmatprep.subr.bf16.mxu1 %v1295_v0 }
  0x50   :  { %1035 = vmatprep.subr.bf16.mxu0 %v1295_v0 }
  0x52   :  { %295 = vmatmul.mubr.bf16.vlgmr.msra.gmra.mxu0 %v156_v31  ;;  %1030 = vmatpush3.bf16.msra.mxu1 %v1148_v34 }
  0x53   :  { %1055 = vmatprep.subr.bf16.mxu1 %v1295_v0  ;;  %1051 = vmatprep.mubr.msk.bf16.mxu0 %vm1297_vm0, %v1295_v0 }
  0x54   :  { %1036 = vmatpush3.bf16.msra.mxu0 %v1149_v35  ;;  %v1179_v35 = vld [vmem:[%s1550_s11 + $0x8] sm:$0xff]  }
  0x55   :  { %1037 = vmatprep.subr.bf16.mxu0 %v1295_v0 }
  0x58   :  { %1038 = vmatpush3.bf16.msra.mxu0 %v1150_v36  ;;  %v1180_v36 = vld [vmem:[%s1550_s11] sm:$0xff]  }
  0x59   :  { %1039 = vmatprep.subr.bf16.mxu0 %v1295_v0 }
  0x5c   :  { %1040 = vmatpush3.bf16.msra.mxu0 %v1151_v37  ;;  %v930_v37 = vld [vmem:[%s1549_s10] ss:$0 sm:$0xff]  ;;  %s1261_s10 = scalar_lea.vmem %s875_s2, 32 }
  0x5d   :  { %1041 = vmatprep.subr.bf16.mxu0 %v1295_v0  ;;  %p1262_p6 = scmp.ne.s32.totalorder %s875_s2, %s1261_s10  ;;  %p1267_p8 = scmp.lt.s32.totalorder %s1261_s10, %s1261_s10 }
  0x5f   :  { %p1268_p9 = por %p1267_p8, %p1266_p7 }
  0x60   :  { %1042 = vmatpush3.bf16.msra.mxu0 %v1152_v38 }
  0x61   :  { %1043 = vmatprep.subr.bf16.mxu0 %v1295_v0  ;;  %p1269_p10 = pnand %p1268_p9, %p1262_p6 }
  0x64   :  { %1044 = vmatpush3.bf16.msra.mxu0 %v1153_v39 }
  0x65   :  { %1045 = vmatprep.subr.bf16.mxu0 %v1295_v0 }
  0x68   :  { %1046 = vmatpush3.bf16.msra.mxu0 %v1154_v40 }
  0x69   :  { %1047 = vmatprep.subr.bf16.mxu0 %v1295_v0 }
  0x6c   :  { %1048 = vmatpush3.bf16.msra.mxu0 %v1155_v50 }
  0x6d   :  { %1049 = vmatprep.subr.bf16.mxu0 %v1295_v0 }
  0x70   :  { %1050 = vmatpush3.bf16.msra.mxu0 %v1156_v51 }
  0x71   :  { %1075 = vmatprep.subr.bf16.mxu0 %v1295_v0 }
 0x112   :  { %v964_v41 = vpop.f32.mrf.mxu0 }
 0x114   :  { %v965_v43 = vpop.f32.mrf.mxu0 }
 0x115   :  { %v966_v44 = vadd.f32 %v965_v43, %v964_v41 }
 0x116   :  { %v967_v45 = vpop.f32.mrf.mxu0 }
 0x117   :  { %v297_v46 = vadd.f32 %v966_v44, %v885_v42 }
 0x118   :  { %v968_v47 = vpop.f32.mrf.mxu0 }
 0x119   :  { %v302_v48 = vmax.f32 %v297_v46, 0.0 }
 0x11b   :  { %v303_v49 = vpack.c.bf16 %v302_v48, %v302_v48 }
 0x11d   :  { %1032 = vmatmul.mubr.bf16.vlgmr.msra.gmra.mxu1 %v303_v49 }
 0x11e   :  { %1071 = vmatprep.mubr.msk.bf16.mxu1 %vm1297_vm0, %v1295_v0  ;;  %1056 = vmatpush3.bf16.msra.mxu1 %v1157_v52 }
 0x11f   :  { %1057 = vmatprep.subr.bf16.mxu1 %v1295_v0 }
 0x122   :  { %1058 = vmatpush3.bf16.msra.mxu1 %v1158_v53 }
 0x123   :  { %1059 = vmatprep.subr.bf16.mxu1 %v1295_v0 }
 0x126   :  { %1060 = vmatpush3.bf16.msra.mxu1 %v1159_v54 }
 0x127   :  { %1061 = vmatprep.subr.bf16.mxu1 %v1295_v0 }
 0x12a   :  { %1062 = vmatpush3.bf16.msra.mxu1 %v1160_v55 }
 0x12b   :  { %1063 = vmatprep.subr.bf16.mxu1 %v1295_v0 }
 0x12e   :  { %1064 = vmatpush3.bf16.msra.mxu1 %v1161_v56 }
 0x12f   :  { %1065 = vmatprep.subr.bf16.mxu1 %v1295_v0 }
 0x132   :  { %1066 = vmatpush3.bf16.msra.mxu1 %v1162_v57 }
 0x133   :  { %1067 = vmatprep.subr.bf16.mxu1 %v1295_v0 }
 0x136   :  { %1068 = vmatpush3.bf16.msra.mxu1 %v1163_v3 }
 0x137   :  { %1069 = vmatprep.subr.bf16.mxu1 %v1295_v0 }
 0x13a   :  { %1070 = vmatpush3.bf16.msra.mxu1 %v1164_v4 }
 0x13b   :  { %1095 = vmatprep.subr.bf16.mxu1 %v1295_v0 }
 0x1dd   :  { %v409_v59 = vpop.f32.mrf.mxu1 }
 0x1de   :  { %v410_v60 = vadd.f32 %v903_v58, %v409_v59 }
 0x1df   :  { %v1033_v61 = vpop.f32.mrf.mxu1 }
 0x1e0   :  { %v415_v62 = vmax.f32 %v410_v60, 0.0 }
 0x1e1   :  { %v412_v63 = vpop.f32.mrf.mxu1 }
 0x1e2   :  { %v416_v1 = vpack.c.bf16 %v415_v62, %v415_v62 }
 0x1e3   :  { %v1034_v2 = vpop.f32.mrf.mxu1 }
 0x1e4   :  { %1052 = vmatmul.mubr.bf16.vlgmr.msra.gmra.mxu0 %v416_v1 }
 0x1e5   :  { %1091 = vmatprep.mubr.msk.bf16.mxu0 %vm1297_vm0, %v1295_v0  ;;  %1076 = vmatpush3.bf16.msra.mxu0 %v1165_v5 }
 0x1e6   :  { %1077 = vmatprep.subr.bf16.mxu0 %v1295_v0 }
 0x1e9   :  { %1078 = vmatpush3.bf16.msra.mxu0 %v1166_v6 }
 0x1ea   :  { %1079 = vmatprep.subr.bf16.mxu0 %v1295_v0 }
 0x1ed   :  { %1080 = vmatpush3.bf16.msra.mxu0 %v1167_v7 }
 0x1ee   :  { %1081 = vmatprep.subr.bf16.mxu0 %v1295_v0 }
 0x1f1   :  { %1082 = vmatpush3.bf16.msra.mxu0 %v1168_v8 }
 0x1f2   :  { %1083 = vmatprep.subr.bf16.mxu0 %v1295_v0 }
 0x1f5   :  { %1084 = vmatpush3.bf16.msra.mxu0 %v1169_v9 }
 0x1f6   :  { %1085 = vmatprep.subr.bf16.mxu0 %v1295_v0 }
 0x1f9   :  { %1086 = vmatpush3.bf16.msra.mxu0 %v1170_v10 }
 0x1fa   :  { %1087 = vmatprep.subr.bf16.mxu0 %v1295_v0 }
 0x1fd   :  { %1088 = vmatpush3.bf16.msra.mxu0 %v1171_v19 }
 0x1fe   :  { %1089 = vmatprep.subr.bf16.mxu0 %v1295_v0 }
 0x201   :  { %1090 = vmatpush3.bf16.msra.mxu0 %v1172_v20 }
 0x2a4   :  { %v522_v12 = vpop.f32.mrf.mxu0 }
 0x2a5   :  { %v523_v13 = vadd.f32 %v912_v11, %v522_v12 }
 0x2a6   :  { %v1053_v14 = vpop.f32.mrf.mxu0 }
 0x2a7   :  { %v528_v15 = vmax.f32 %v523_v13, 0.0 }
 0x2a8   :  { %v525_v16 = vpop.f32.mrf.mxu0 }
 0x2a9   :  { %v529_v17 = vpack.c.bf16 %v528_v15, %v528_v15 }
 0x2aa   :  { %v1054_v18 = vpop.f32.mrf.mxu0 }
 0x2ab   :  { %1072 = vmatmul.mubr.bf16.vlgmr.msra.gmra.mxu1 %v529_v17 }
 0x2ac   :  { %1111 = vmatprep.mubr.msk.bf16.mxu1 %vm1297_vm0, %v1295_v0  ;;  %1096 = vmatpush3.bf16.msra.mxu1 %v1173_v21 }
 0x2ad   :  { %1097 = vmatprep.subr.bf16.mxu1 %v1295_v0 }
 0x2b0   :  { %1098 = vmatpush3.bf16.msra.mxu1 %v1174_v22 }
 0x2b1   :  { %1099 = vmatprep.subr.bf16.mxu1 %v1295_v0 }
 0x2b4   :  { %1100 = vmatpush3.bf16.msra.mxu1 %v1175_v23 }
 0x2b5   :  { %1101 = vmatprep.subr.bf16.mxu1 %v1295_v0 }
 0x2b8   :  { %1102 = vmatpush3.bf16.msra.mxu1 %v1176_v24 }
 0x2b9   :  { %1103 = vmatprep.subr.bf16.mxu1 %v1295_v0 }
 0x2bc   :  { %1104 = vmatpush3.bf16.msra.mxu1 %v1177_v25 }
 0x2bd   :  { %1105 = vmatprep.subr.bf16.mxu1 %v1295_v0 }
 0x2c0   :  { %1106 = vmatpush3.bf16.msra.mxu1 %v1178_v26 }
 0x2c1   :  { %1107 = vmatprep.subr.bf16.mxu1 %v1295_v0 }
 0x2c4   :  { %1108 = vmatpush3.bf16.msra.mxu1 %v1179_v35 }
 0x2c5   :  { %1109 = vmatprep.subr.bf16.mxu1 %v1295_v0  ;;  %v939_v0 = vld [vmem:[%s1551_s12] ss:$0 sm:$0xff] }
 0x2c8   :  { %1110 = vmatpush3.bf16.msra.mxu1 %v1180_v36 }
 0x36b   :  { %v635_v28 = vpop.f32.mrf.mxu1 }
 0x36c   :  { %v636_v29 = vadd.f32 %v921_v27, %v635_v28 }
 0x36d   :  { %v1073_v30 = vpop.f32.mrf.mxu1 }
 0x36e   :  { %v641_v31 = vmax.f32 %v636_v29, 0.0 }
 0x36f   :  { %v638_v32 = vpop.f32.mrf.mxu1 }
 0x370   :  { %v642_v33 = vpack.c.bf16 %v641_v31, %v641_v31 }
 0x371   :  { %v1074_v34 = vpop.f32.mrf.mxu1 }
 0x372   :  { %1092 = vmatmul.mubr.bf16.vlgmr.msra.gmra.mxu0 %v642_v33 }
 0x432   :  { %v748_v38 = vpop.f32.mrf.mxu0 }
 0x433   :  { %v749_v39 = vadd.f32 %v930_v37, %v748_v38 }
 0x434   :  { %v1093_v40 = vpop.f32.mrf.mxu0 }
 0x435   :  { %v754_v41 = vmax.f32 %v749_v39, 0.0 }
 0x436   :  { %v751_v42 = vpop.f32.mrf.mxu0 }
 0x437   :  { %v755_v43 = vpack.c.bf16 %v754_v41, %v754_v41 }
 0x438   :  { %v1094_v44 = vpop.f32.mrf.mxu0 }
 0x439   :  { %1112 = vmatmul.mubr.bf16.vlgmr.msra.gmra.mxu1 %v755_v43 }
 0x4f9   :  { %v861_v45 = vpop.f32.mrf.mxu1 }
 0x4fa   :  { %v862_v46 = vadd.f32 %v939_v0, %v861_v45 }
 0x4fb   :  { %v1113_v47 = vpop.f32.mrf.mxu1 }
 0x4fc   :  { %867 = vst [vmem:[#allocation10] sm:$0x3] %v862_v46 }
 0x4fd   :  { %v864_v48 = vpop.f32.mrf.mxu1 }
 0x4fe   :  { %1272 = shalt.err (!%p1269_p10)
}
 0x4ff   :  { %877 = dma.vmem_to_hbm [thread:$0]  %s875_s2, 32, %s1552_s13, [#allocation4]   ;;  %v1114_v49 = vpop.f32.mrf.mxu1 }
 0x500   :  { %1287 = dma.done.wait [#allocation4], 32  }
 0x501   :  { %1288 = vsyncadd [#allocation4], 4294967264 }
 0x502   :  { %881 = vsyncpa [#allocation3], 1 }
 0x503   :  { %882 = vsyncpa [#allocation6], 1 }
 0x504   :  { %883 = vsyncpa [#allocation9], 1 }
 0x505   :  { %884 = vsyncpa [#allocation4], 1 }

</bundles_post_ra>
